<compile_context>
chip_gen: v6e
topology: v6e:2x2x1
jax: 0.10.0
libtpu: 0.0.40
codegen_flags: <defaults>
</compile_context>

<pallas_src>
import functools

import jax
import jax.numpy as jnp
from jax.experimental import pallas as pl
from jax.experimental.pallas import tpu as pltpu


def _round_up(n, m):
    return ((n + m - 1) // m) * m


def _cdiv(a, b):
    return (a + b - 1) // b


def club_forward_kernel(x_ref, y_ref, ys_ref,
                        w1_ref, b1_ref, w2_ref, b2_ref,
                        out_ref, *, n_valid, tile_b, approx_recip):
    x = x_ref[...]            # [TB, x_dim]  (f32 or bf16)
    y = y_ref[...]            # [TB, y_dim]  f32
    ys = ys_ref[...]          # [TB, y_dim]  f32 (shuffled y)
    y_dim = y.shape[-1]

    # Layer 1 (fused mu/logvar heads): one wide matmul on the MXU, f32 accum.
    h = jnp.dot(x, w1_ref[...], preferred_element_type=jnp.float32)
    h = jnp.maximum(h + b1_ref[...], 0.0)                  # [TB, 2H] f32

    # Layer 2 (block-diagonal fused weights): one wide matmul, f32 accum.
    o = jnp.dot(h.astype(w2_ref.dtype), w2_ref[...],
                preferred_element_type=jnp.float32)
    o = o + b2_ref[...]                                    # [TB, 2*y_dim] f32

    mu = o[:, :y_dim]
    logvar = jnp.tanh(o[:, y_dim:])

    # inv_var = 1 / (exp(logvar) + 1e-6): exp on EUP; approx vrcp on perf path.
    inv_var = pl.reciprocal(jnp.exp(logvar) + 1e-6, approx=approx_recip)

    # positive - negative == (y - ys) * (2*mu - y - ys) * inv_var
    diff = (y - ys) * (2.0 * mu - y - ys) * inv_var        # [TB, y_dim]

    # In-kernel mask for the ragged final tile (no wrapper-side jnp.pad).
    # n_valid / tile_b are static Python ints, so full-multiple cases skip this.
    if n_valid % tile_b != 0:
        row = (pl.program_id(0) * tile_b
               + jax.lax.broadcasted_iota(jnp.int32, (tile_b, 1), 0))
        diff = jnp.where(row < n_valid, diff, 0.0)

    # Per-tile partial sum -> scalar in SMEM (final /(2N) done in the wrapper).
    out_ref[0, 0] = jnp.sum(diff)


def fuse_params(params, matmul_dtype=jnp.bfloat16):
    """Fused weight matrices. Matmul weights in `matmul_dtype`, biases in f32."""
    wmu1, bmu1, wmu2, bmu2, wlv1, blv1, wlv2, blv2 = params
    hidden, y_dim = wmu2.shape
    w1 = jnp.concatenate([wmu1, wlv1], axis=1).astype(matmul_dtype)   # [x_dim, 2H]
    b1 = jnp.concatenate([bmu1, blv1], axis=1)                        # [1, 2H] f32
    zeros = jnp.zeros((hidden, y_dim), jnp.float32)
    w2 = jnp.block([[wmu2, zeros],
                    [zeros, wlv2]]).astype(matmul_dtype)              # [2H, 2Y]
    b2 = jnp.concatenate([bmu2, blv2], axis=1)                        # [1, 2Y] f32
    return w1, b1, w2, b2


@functools.partial(jax.jit, static_argnames=("tb",))
def club_forward(x, y, y_shuf, fused_params, tb=16384):
    w1, b1, w2, b2 = fused_params
    n, x_dim = x.shape
    y_dim = y.shape[1]

    use_bf16 = (w1.dtype == jnp.bfloat16)
    x = x.astype(w1.dtype)        # bf16 MXU inputs on the perf path (halves x bytes)

    # --- Batch tile selection (all static under jit) ---
    # Multiple of the sublane packing (8 rows f32, 16 rows bf16); large by
    # default (amortizes the ~0.35us/step fixed cost), but capped so there are
    # >=2 grid tiles whenever possible for v7x's two TensorCores.  At the
    # 16384-row default, double-buffered inputs + intermediates stay well
    # inside the 48 MiB VMEM budget (v7x has only 64 MiB physical).
    min_rows = 16 if use_bf16 else 8
    tb = max(min_rows, (int(tb) // min_rows) * min_rows)
    half = _round_up(_cdiv(n, 2), min_rows)
    tile_b = max(min_rows, min(tb, half))
    num_tiles = _cdiv(n, tile_b)

    kernel = functools.partial(
        club_forward_kernel,
        n_valid=n, tile_b=tile_b, approx_recip=use_bf16)

    partials = pl.pallas_call(
        kernel,
        out_shape=jax.ShapeDtypeStruct((num_tiles, 1), jnp.float32),
        grid=(num_tiles,),
        in_specs=[
            pl.BlockSpec((tile_b, x_dim), lambda i: (i, 0)),
            pl.BlockSpec((tile_b, y_dim), lambda i: (i, 0)),
            pl.BlockSpec((tile_b, y_dim), lambda i: (i, 0)),
            # Weights / biases: constant block index -> VMEM-resident, DMA'd once.
            pl.BlockSpec(w1.shape, lambda i: (0, 0)),
            pl.BlockSpec(b1.shape, lambda i: (0, 0)),
            pl.BlockSpec(w2.shape, lambda i: (0, 0)),
            pl.BlockSpec(b2.shape, lambda i: (0, 0)),
        ],
        # Per-tile scalar partials go to SMEM (scalar path, no masked VMEM vst).
        out_specs=pl.BlockSpec((1, 1), lambda i: (i, 0),
                               memory_space=pltpu.MemorySpace.SMEM),
        compiler_params=pltpu.CompilerParams(
            dimension_semantics=("parallel",),      # batch tiles are independent
            vmem_limit_bytes=48 * 1024 * 1024,      # safe on v7x (64 MiB physical)
        ),
    )(x, y, y_shuf, w1, b1, w2, b2)

    # Global mean over the ORIGINAL n, divided by 2.
    return jnp.sum(partials) / (2.0 * n)


def init_params(key, x_dim, y_dim, hidden):
    """Deterministic init: Linear weights stored as [in, out], biases as [1, out]."""
    ks = jax.random.split(key, 8)

    def lin(kw, kb, fan_in, fan_out):
        bound = 1.0 / jnp.sqrt(fan_in)
        w = jax.random.uniform(kw, (fan_in, fan_out), jnp.float32, -bound, bound)
        b = jax.random.uniform(kb, (1, fan_out), jnp.float32, -bound, bound)
        return w, b

    wmu1, bmu1 = lin(ks[0], ks[1], x_dim, hidden)
    wmu2, bmu2 = lin(ks[2], ks[3], hidden, y_dim)
    wlv1, blv1 = lin(ks[4], ks[5], x_dim, hidden)
    wlv2, blv2 = lin(ks[6], ks[7], hidden, y_dim)
    return (wmu1, bmu1, wmu2, bmu2, wlv1, blv1, wlv2, blv2)


def reference_forward(x, y, y_shuf, params):
    """Plain-JAX (f32) replica of CLUBSample.forward given the same permutation."""
    wmu1, bmu1, wmu2, bmu2, wlv1, blv1, wlv2, blv2 = params
    mu = jnp.maximum(x @ wmu1 + bmu1, 0.0) @ wmu2 + bmu2
    logvar = jnp.tanh(jnp.maximum(x @ wlv1 + blv1, 0.0) @ wlv2 + blv2)
    inv_var = 1.0 / (jnp.exp(logvar) + 1e-6)
    pos = -(mu - y) ** 2 * inv_var
    neg = -(mu - y_shuf) ** 2 * inv_var
    return (pos.sum(-1) - neg.sum(-1)).mean() / 2.0


if __name__ == "__main__":
    X_DIM, Y_DIM, HIDDEN = 32, 16, 32

    root = jax.random.PRNGKey(0)
    k_param, k_data = jax.random.split(root)
    params = init_params(k_param, X_DIM, Y_DIM, HIDDEN)

    fused_bf16 = fuse_params(params, jnp.bfloat16)   # default perf path
    fused_f32 = fuse_params(params, jnp.float32)     # exact-validation path

    ok = True
    # (N, tb): exercises single tile, multi-tile with ragged masked tail, and
    # the >=2-tile split used for v7x's two TensorCores.
    cases = [(8, 16384), (20, 8), (300, 128)]
    for case_i, (N, tb) in enumerate(cases):
        kx, ky, kp = jax.random.split(jax.random.fold_in(k_data, case_i), 3)
        x = jax.random.normal(kx, (N, X_DIM), jnp.float32)
        y = jax.random.normal(ky, (N, Y_DIM), jnp.float32)

        # torch.randperm equivalent (deterministic): gather done in plain-JAX glue.
        perm = jax.random.permutation(kp, N)
        y_shuf = y[perm]

        ref = reference_forward(x, y, y_shuf, params)

        # Exact path: f32 matmuls + exact reciprocal -> tight tolerance.
        out_f32 = jax.block_until_ready(club_forward(x, y, y_shuf, fused_f32, tb=tb))
        if not jnp.allclose(out_f32, ref, rtol=1e-4, atol=1e-4):
            ok = False
            print("MISMATCH f32", case_i, out_f32, ref)

        # Perf path: bf16 MXU inputs (f32 accumulation) + approx EUP reciprocal.
        # Tolerance loosened for the bf16 input quantization.
        out_bf16 = jax.block_until_ready(club_forward(x, y, y_shuf, fused_bf16, tb=tb))
        if not jnp.allclose(out_bf16, ref, rtol=5e-2, atol=5e-2):
            ok = False
            print("MISMATCH bf16", case_i, out_bf16, ref)

    if ok:
        print("KERNEL_OK")
</pallas_src>

<mosaic_0001>
module attributes {stable_mosaic.version = 11 : i64} {
  func.func @club_forward_kernel(%arg0: i32, %arg1: memref<8x32xf32, #tpu.memory_space<vmem>>, %arg2: memref<8x16xf32, #tpu.memory_space<vmem>>, %arg3: memref<8x16xf32, #tpu.memory_space<vmem>>, %arg4: memref<32x64xf32, #tpu.memory_space<vmem>>, %arg5: memref<1x64xf32, #tpu.memory_space<vmem>>, %arg6: memref<64x32xf32, #tpu.memory_space<vmem>>, %arg7: memref<1x32xf32, #tpu.memory_space<vmem>>, %arg8: memref<1x1xf32, #tpu.memory_space<smem>>) attributes {dimension_semantics = [#tpu.dimension_semantics<parallel>], iteration_bounds = array<i64: 1>, scalar_prefetch = 0 : i64, scratch_operands = 0 : i64, tpu.core_type = #tpu.core_type<tc>, window_params = [{transform_indices = @transform_0, window_bounds = array<i64: 8, 32>}, {transform_indices = @transform_1, window_bounds = array<i64: 8, 16>}, {transform_indices = @transform_2, window_bounds = array<i64: 8, 16>}, {pipeline_mode = #tpu.pipeline_mode<synchronous>, transform_indices = @transform_3, window_bounds = array<i64: 32, 64>}, {pipeline_mode = #tpu.pipeline_mode<synchronous>, transform_indices = @transform_4, window_bounds = array<i64: 1, 64>}, {pipeline_mode = #tpu.pipeline_mode<synchronous>, transform_indices = @transform_5, window_bounds = array<i64: 64, 32>}, {pipeline_mode = #tpu.pipeline_mode<synchronous>, transform_indices = @transform_6, window_bounds = array<i64: 1, 32>}, {transform_indices = @transform_7, window_bounds = array<i64: 1, 1>}]} {
    %c0 = arith.constant 0 : index
    %c0_0 = arith.constant 0 : index
    %0 = vector.load %arg1[%c0, %c0_0] : memref<8x32xf32, #tpu.memory_space<vmem>>, vector<8x32xf32>
    %c0_1 = arith.constant 0 : index
    %c0_2 = arith.constant 0 : index
    %1 = vector.load %arg2[%c0_1, %c0_2] : memref<8x16xf32, #tpu.memory_space<vmem>>, vector<8x16xf32>
    %c0_3 = arith.constant 0 : index
    %c0_4 = arith.constant 0 : index
    %2 = vector.load %arg3[%c0_3, %c0_4] : memref<8x16xf32, #tpu.memory_space<vmem>>, vector<8x16xf32>
    %c0_5 = arith.constant 0 : index
    %c0_6 = arith.constant 0 : index
    %3 = vector.load %arg4[%c0_5, %c0_6] : memref<32x64xf32, #tpu.memory_space<vmem>>, vector<32x64xf32>
    %cst = arith.constant dense<0.000000e+00> : vector<8x64xf32>
    %4 = tpu.matmul %0, %3, %cst {dimension_numbers = #tpu.dot_dimension_numbers<[1], [0], [0], [1], [0, 0, 1, 1], [], []>} : vector<8x32xf32>, vector<32x64xf32>, vector<8x64xf32> -> vector<8x64xf32>
    %c0_7 = arith.constant 0 : index
    %c0_8 = arith.constant 0 : index
    %5 = vector.load %arg5[%c0_7, %c0_8] : memref<1x64xf32, #tpu.memory_space<vmem>>, vector<1x64xf32>
    %6 = vector.broadcast %5 : vector<1x64xf32> to vector<8x64xf32>
    %7 = arith.addf %4, %6 : vector<8x64xf32>
    %cst_9 = arith.constant 0.000000e+00 : f32
    %8 = vector.broadcast %cst_9 : f32 to vector<8x64xf32>
    %9 = arith.maximumf %7, %8 : vector<8x64xf32>
    %c0_10 = arith.constant 0 : index
    %c0_11 = arith.constant 0 : index
    %10 = vector.load %arg6[%c0_10, %c0_11] : memref<64x32xf32, #tpu.memory_space<vmem>>, vector<64x32xf32>
    %cst_12 = arith.constant dense<0.000000e+00> : vector<8x32xf32>
    %11 = tpu.matmul %9, %10, %cst_12 {dimension_numbers = #tpu.dot_dimension_numbers<[1], [0], [0], [1], [0, 0, 1, 1], [], []>} : vector<8x64xf32>, vector<64x32xf32>, vector<8x32xf32> -> vector<8x32xf32>
    %c0_13 = arith.constant 0 : index
    %c0_14 = arith.constant 0 : index
    %12 = vector.load %arg7[%c0_13, %c0_14] : memref<1x32xf32, #tpu.memory_space<vmem>>, vector<1x32xf32>
    %13 = vector.broadcast %12 : vector<1x32xf32> to vector<8x32xf32>
    %14 = arith.addf %11, %13 : vector<8x32xf32>
    %15 = vector.extract_strided_slice %14 {offsets = [0, 0], sizes = [8, 16], strides = [1, 1]} : vector<8x32xf32> to vector<8x16xf32>
    %16 = vector.extract_strided_slice %14 {offsets = [0, 16], sizes = [8, 16], strides = [1, 1]} : vector<8x32xf32> to vector<8x16xf32>
    %17 = math.tanh %16 : vector<8x16xf32>
    %18 = math.exp %17 : vector<8x16xf32>
    %cst_15 = arith.constant 9.99999997E-7 : f32
    %19 = vector.broadcast %cst_15 : f32 to vector<8x16xf32>
    %20 = arith.addf %18, %19 : vector<8x16xf32>
    %21 = tpu.reciprocal %20 : vector<8x16xf32> -> vector<8x16xf32>
    %22 = arith.subf %1, %2 : vector<8x16xf32>
    %cst_16 = arith.constant 2.000000e+00 : f32
    %23 = vector.broadcast %cst_16 : f32 to vector<8x16xf32>
    %24 = arith.mulf %23, %15 : vector<8x16xf32>
    %25 = arith.subf %24, %1 : vector<8x16xf32>
    %26 = arith.subf %25, %2 : vector<8x16xf32>
    %27 = arith.mulf %22, %26 : vector<8x16xf32>
    %28 = arith.mulf %27, %21 : vector<8x16xf32>
    %29 = vector.shape_cast %28 : vector<8x16xf32> to vector<1x8x16xf32>
    %cst_17 = arith.constant dense<0.000000e+00> : vector<1xf32>
    %30 = vector.multi_reduction <add>, %29, %cst_17 [1, 2] : vector<1x8x16xf32> to vector<1xf32>
    %31 = vector.shape_cast %30 : vector<1xf32> to vector<1x1x1xf32>
    %32 = vector.extract %31[0, 0, 0] : f32 from vector<1x1x1xf32>
    %c0_18 = arith.constant 0 : index
    %c0_19 = arith.constant 0 : index
    %33 = memref.load %arg8[%c0_18, %c0_19] : memref<1x1xf32, #tpu.memory_space<smem>>
    memref.store %32, %arg8[%c0_18, %c0_19] : memref<1x1xf32, #tpu.memory_space<smem>>
    return
  }
  func.func @transform_0(%arg0: i32) -> (i32, i32) {
    %c0_i32 = arith.constant 0 : i32
    %c0_i32_0 = arith.constant 0 : i32
    return %arg0, %c0_i32 : i32, i32
  }
  func.func @transform_1(%arg0: i32) -> (i32, i32) {
    %c0_i32 = arith.constant 0 : i32
    %c0_i32_0 = arith.constant 0 : i32
    return %arg0, %c0_i32 : i32, i32
  }
  func.func @transform_2(%arg0: i32) -> (i32, i32) {
    %c0_i32 = arith.constant 0 : i32
    %c0_i32_0 = arith.constant 0 : i32
    return %arg0, %c0_i32 : i32, i32
  }
  func.func @transform_3(%arg0: i32) -> (i32, i32) {
    %c0_i32 = arith.constant 0 : i32
    %c0_i32_0 = arith.constant 0 : i32
    %c0_i32_1 = arith.constant 0 : i32
    return %c0_i32, %c0_i32_0 : i32, i32
  }
  func.func @transform_4(%arg0: i32) -> (i32, i32) {
    %c0_i32 = arith.constant 0 : i32
    %c0_i32_0 = arith.constant 0 : i32
    %c0_i32_1 = arith.constant 0 : i32
    return %c0_i32, %c0_i32_0 : i32, i32
  }
  func.func @transform_5(%arg0: i32) -> (i32, i32) {
    %c0_i32 = arith.constant 0 : i32
    %c0_i32_0 = arith.constant 0 : i32
    %c0_i32_1 = arith.constant 0 : i32
    return %c0_i32, %c0_i32_0 : i32, i32
  }
  func.func @transform_6(%arg0: i32) -> (i32, i32) {
    %c0_i32 = arith.constant 0 : i32
    %c0_i32_0 = arith.constant 0 : i32
    %c0_i32_1 = arith.constant 0 : i32
    return %c0_i32, %c0_i32_0 : i32, i32
  }
  func.func @transform_7(%arg0: i32) -> (i32, i32) {
    %c0_i32 = arith.constant 0 : i32
    %c0_i32_0 = arith.constant 0 : i32
    return %arg0, %c0_i32 : i32, i32
  }
}

</mosaic_0001>

<bundles_post_ra>
// kernel: club_forward.1
= control target key start
LH: loop header
LB: loop body
LE: loop exit
PB: predicated region body
PF: predicated region fallthrough
CT: control target
= control target key end

     0   :  { %v316_v1 = vmov 0.0   ;;  %vm317_vm0 = vmmov 0   ;;  %s416_s0 = inlined_call_operand.vmem [shape: f32[8,32], index: 0, kind: input, shape index: {}]   ;;  %s417_s1 = inlined_call_operand.vmem [shape: f32[8,16], index: 1, kind: input, shape index: {}]   ;;  %s418_s2 = inlined_call_operand.vmem [shape: f32[8,16], index: 2, kind: input, shape index: {}]   ;;  %s419_s3 = inlined_call_operand.vmem [shape: f32[32,64], index: 3, kind: input, shape index: {}]   ;;  %s420_s4 = inlined_call_operand.vmem [shape: f32[1,64], index: 4, kind: input, shape index: {}]   ;;  %s421_s5 = inlined_call_operand.vmem [shape: f32[64,32], index: 5, kind: input, shape index: {}]   ;;  %s422_s6 = inlined_call_operand.vmem [shape: f32[1,32], index: 6, kind: input, shape index: {}]   ;;  %s423_s7 = inlined_call_operand.hbm [shape: f32[1,1], index: 7, kind: output, shape index: {}]  }
   0x1   :  { %v33_v0 = vld [vmem:[%s419_s3 + $0x18] sm:$0xff]  ;;  %264 = vmatprep.subr.mxu0 %v316_v1  ;;  %v32_v2 = vld [vmem:[%s419_s3 + $0x10] sm:$0xff]  ;;  %272 = vmatprep.mubr.msk.f32.mxu0 %vm317_vm0, %v316_v1  ;;  %v31_v5 = vld [vmem:[%s419_s3 + $0x8] sm:$0xff] }
   0x2   :  { %v123_v3 = vld [vmem:[%s421_s5 + $0x38] sm:$0xff]  ;;  %265 = vmatpush3.msra.mxu0 %v33_v0  ;;  %275 = vmatprep.subr.mxu1 %v316_v1  ;;  %v122_v4 = vld [vmem:[%s421_s5 + $0x30] sm:$0xff] }
   0x3   :  { %266 = vmatprep.subr.mxu0 %v316_v1  ;;  %276 = vmatpush3.msra.mxu1 %v123_v3 }
   0x4   :  { %12 = vsyncpa [#allocation3], 0  ;;  %267 = vmatpush3.msra.mxu0 %v32_v2  ;;  %277 = vmatprep.subr.mxu1 %v316_v1  ;;  %v121_v6 = vld [vmem:[%s421_s5 + $0x28] sm:$0xff]  ;;  %v30_v7 = vld [vmem:[%s419_s3] sm:$0xff]  ;;  %vm41_vm1 = vcmask 261120   ;;  %vm131_vm2 = vcmask 523264  }
   0x5   :  { %268 = vmatprep.subr.mxu0 %v316_v1  ;;  %278 = vmatpush3.msra.mxu1 %v122_v4  ;;  %v27_v8 = vld [vmem:[%s416_s0] sm:$0xff]  ;;  %v119_v10 = vld [vmem:[%s421_s5 + $0x18] sm:$0xff]  ;;  %v118_v11 = vld [vmem:[%s421_s5 + $0x10] sm:$0xff]  ;;  %vm220_vm3 = vcmask 130048   ;;  %s319_s8 = smov [#allocation2]  }
   0x6   :  { %269 = vmatpush3.msra.mxu0 %v31_v5  ;;  %279 = vmatprep.subr.mxu1 %v316_v1  ;;  %v120_v9 = vld [vmem:[%s421_s5 + $0x20] sm:$0xff]  ;;  %v117_v12 = vld [vmem:[%s421_s5 + $0x8] sm:$0xff] }
   0x7   :  { %270 = vmatprep.subr.mxu0 %v316_v1  ;;  %280 = vmatpush3.msra.mxu1 %v121_v6  ;;  %v116_v13 = vld [vmem:[%s421_s5] sm:$0xff] }
   0x8   :  { %271 = vmatpush3.msra.mxu0 %v30_v7  ;;  %281 = vmatprep.subr.mxu1 %v316_v1  ;;  %v246_v14 = vld [vmem:[%s420_s4] ss:$0 sm:$0xff]  ;;  %s318_s4 = smov 112  }
   0x9   :  { %273 = vmatmul.mubr.msk.f32.vlgmr.msra.gmra.mxu0 %vm41_vm1, %v27_v8  ;;  %282 = vmatpush3.msra.mxu1 %v120_v9  ;;  %v248_v19 = vld [vmem:[%s422_s6] ss:$0 sm:$0xff] }
   0xa   :  { %283 = vmatprep.subr.mxu1 %v316_v1  ;;  %291 = vmatprep.mubr.msk.f32.mxu1 %vm317_vm0, %v316_v1  ;;  %v28_v29 = vld [vmem:[%s417_s1] sm:$0xff] }
   0xb   :  { %284 = vmatpush3.msra.mxu1 %v119_v10  ;;  %v29_v31 = vld [vmem:[%s418_s2] sm:$0xff] }
   0xc   :  { %285 = vmatprep.subr.mxu1 %v316_v1  ;;  %v210_v32 = vsub.f32 %v28_v29, %v29_v31 }
   0xd   :  { %286 = vmatpush3.msra.mxu1 %v118_v11 }
   0xe   :  { %287 = vmatprep.subr.mxu1 %v316_v1 }
   0xf   :  { %288 = vmatpush3.msra.mxu1 %v117_v12 }
  0x10   :  { %289 = vmatprep.subr.mxu1 %v316_v1 }
  0x11   :  { %290 = vmatpush3.msra.mxu1 %v116_v13 }
  0xc9   :  { %v111_v15 = vpop.f32.mrf.mxu0 }
  0xca   :  { %v112_v16 = vadd.f32 %v246_v14, %v111_v15 }
  0xcb   :  { %v274_v17 = vpop.f32.mrf.mxu0 }
  0xcc   :  { %v115_v18 = vmax.f32 %v112_v16, 0.0 }
  0xce   :  { %292 = vmatmul.mubr.msk.f32.vlgmr.msra.gmra.mxu1 %vm131_vm2, %v115_v18 }
 0x18e   :  { %v201_v20 = vpop.f32.mrf.mxu1 }
 0x18f   :  { %v202_v21 = vadd.f32 %v248_v19, %v201_v20 }
 0x190   :  { %v293_v22 = vpop.f32.mrf.mxu1 }
 0x191   :  { %300 = vtanh.f32 %v202_v21  ;;  %v211_v28 = vmul.f32 2.0, %v202_v21 }
 0x193   :  { %v212_v30 = vsub.f32 %v211_v28, %v28_v29 }
 0x195   :  { %v213_v33 = vsub.f32 %v212_v30, %v29_v31 }
 0x197   :  { %v214_v34 = vmul.f32 %v213_v33, %v210_v32 }
 0x19e   :  { %v301_v23 = vpop.eup %300 }
 0x19f   :  { %v206_v24 = vmul.f32 1.442695, %v301_v23 }
 0x1a1   :  { %302 = vpow2.f32 %v206_v24 }
 0x1ae   :  { %v303_v25 = vpop.eup %302 }
 0x1af   :  { %v208_v26 = vadd.f32 1e-06, %v303_v25 }
 0x1b1   :  { %304 = vrcp.f32 %v208_v26 }
 0x1be   :  { %v305_v27 = vpop.eup %304 }
 0x1bf   :  { %216 = vrot.lane.b32.xlu0 %v305_v27, %s318_s4 }
 0x231   :  { %v217_v35 = vpop.permute.xlu0 %216 }
 0x232   :  { %v219_v36 = vmul.f32 %v217_v35, %v214_v34 }
 0x234   :  { %v221_v37 = vsel %vm220_vm3, %v219_v36, 0.0 }
 0x235   :  { %222 = vadd.xlane.f32.xlu0 %v221_v37 }
 0x2be   :  { %v223_v38 = vpop.xlane.xlu0 %222 }
 0x2bf   :  { %v224_v39 = vrot.slane %v223_v38, 4 }
 0x2c1   :  { %v225_v40 = vadd.f32 %v224_v39, %v223_v38 }
 0x2c3   :  { %v226_v41 = vrot.slane %v225_v40, 2 }
 0x2c5   :  { %v227_v42 = vadd.f32 %v226_v41, %v225_v40 }
 0x2c7   :  { %v228_v43 = vrot.slane %v227_v42, 1 }
 0x2c9   :  { %v229_v44 = vadd.f32 %v228_v43, %v227_v42 }
 0x2cb   :  { %294 = vpush %v229_v44 }
 0x2fc   :  { %s295_s1 = spop %294 }
 0x2fd   :  { %232 = sst [smem:[#allocation2]] %s295_s1 }
 0x2fe   :  { %240 = dma.smem_to_hbm %s319_s8, 16, %s423_s7, [#allocation3]  }
 0x2ff   :  { %314 = dma.done.wait [#allocation3], 16  }
 0x300   :  { %315 = vsyncadd [#allocation3], 4294967280 }
 0x301   :  { %244 = sfence }
 0x302   :  { %245 = vsyncpa [#allocation3], 1 }

</bundles_post_ra>
